<compile_context>
chip_gen: v7x
topology: tpu7x:2x2x1
jax: 0.10.0
libtpu: 0.0.40
codegen_flags: <defaults>
</compile_context>

<pallas_src>
import math

import jax
import jax.numpy as jnp
from jax.experimental import pallas as pl
from jax.experimental.pallas import tpu as pltpu


# ---------------------------------------------------------------------------
# Backward hot path:  out = -coeff * g   (tiled Pallas TPU kernel)
# ---------------------------------------------------------------------------
_TARGET_TILE_BYTES = 4 * 1024 * 1024    # ~4 MiB payload per tile (85%+ of roofline)
_MIN_KERNEL_ELEMS = 64 * 1024           # below this, a fused XLA multiply is cheaper
_VMEM_LIMIT_BYTES = 32 * 1024 * 1024    # raise v5e's 16 MiB default; OK on v6e/v7x


def _scale_kernel(g_ref, c_ref, o_ref):
    # c_ref: (1,) f32 scalar in SMEM (runtime operand, not a baked constant).
    # Multiply in the storage dtype (native bf16 VALU on v6e/v7x).
    o_ref[...] = g_ref[...] * c_ref[0].astype(o_ref.dtype)


def _reverse_scale(g: jax.Array, coeff) -> jax.Array:
    """Compute -coeff * g elementwise (Pallas kernel for large, lane-friendly g)."""
    orig_shape = g.shape
    dtype = g.dtype
    n = g.size
    neg_coeff = (-jnp.asarray(coeff, jnp.float32)).reshape((1,))

    # Tiny or non-128-divisible gradients: a single fused XLA multiply is
    # strictly cheaper than a dedicated kernel launch and keeps HBM traffic at
    # exactly 2n bytes (no pad/slice copies).
    if n < _MIN_KERNEL_ELEMS or n % 128 != 0:
        return (g * neg_coeff[0].astype(dtype)).reshape(orig_shape)

    # Widest lane-dense slab that divides the element count.
    width = 128
    for w in (2048, 1024, 512, 256):
        if n % w == 0:
            width = w
            break
    flat = g.reshape(-1, width)
    rows = flat.shape[0]

    itemsize = jnp.dtype(dtype).itemsize
    row_align = max(8, 32 // itemsize)          # 8 (f32) / 16 (bf16) / 32 (int8)

    # ~4 MiB payload tile, rows rounded down to the sublane alignment.
    tile_rows = max(row_align,
                    (_TARGET_TILE_BYTES // (width * itemsize)) // row_align * row_align)
    tile_rows = min(tile_rows, rows)
    if tile_rows >= rows:
        tile_rows = rows
        # Keep >=2 grid steps when possible so both v7x TensorCores stream.
        if rows >= 2 * row_align:
            half = -(-rows // 2)
            tile_rows = -(-half // row_align) * row_align

    grid = (pl.cdiv(rows, tile_rows),)

    out = pl.pallas_call(
        _scale_kernel,
        out_shape=jax.ShapeDtypeStruct(flat.shape, dtype),
        grid=grid,
        in_specs=[
            pl.BlockSpec((tile_rows, width), lambda i: (i, 0)),
            pl.BlockSpec(memory_space=pltpu.MemorySpace.SMEM),   # (1,) coeff scalar
        ],
        out_specs=pl.BlockSpec((tile_rows, width), lambda i: (i, 0)),
        input_output_aliases={0: 0},
        compiler_params=pltpu.CompilerParams(
            dimension_semantics=("parallel",),
            vmem_limit_bytes=_VMEM_LIMIT_BYTES),
        cost_estimate=pl.CostEstimate(
            flops=n, transcendentals=0, bytes_accessed=2 * n * itemsize),
    )(flat, neg_coeff)

    return out.reshape(orig_shape)


# ---------------------------------------------------------------------------
# Gradient-reverse function with custom VJP
#   forward  : identity (no kernel, no HBM round trip)
#   backward : -coeff * grad_output (Pallas kernel for large gradients)
# coeff is a traced scalar -> no recompile when the warm-start schedule advances.
# ---------------------------------------------------------------------------
@jax.custom_vjp
def gradient_reverse(x: jax.Array, coeff=1.0) -> jax.Array:
    del coeff
    return x


def _grl_fwd(x, coeff):
    return x, coeff


def _grl_bwd(res, g):
    coeff = res
    return _reverse_scale(g, coeff), jnp.zeros_like(coeff)


gradient_reverse.defvjp(_grl_fwd, _grl_bwd)


# ---------------------------------------------------------------------------
# Module wrapper mirroring WarmStartGradientReverseLayer
# ---------------------------------------------------------------------------
class WarmStartGradientReverseLayer:
    def __init__(self, alpha=1.0, lo=0.0, hi=1.0, max_iters=1000, auto_step=False):
        self.alpha = alpha
        self.lo = lo
        self.hi = hi
        self.iter_num = 0
        self.max_iters = max_iters
        self.auto_step = auto_step

    def _coeff(self) -> float:
        return float(
            2.0 * (self.hi - self.lo)
            / (1.0 + math.exp(-self.alpha * self.iter_num / self.max_iters))
            - (self.hi - self.lo)
            + self.lo
        )

    def __call__(self, x: jax.Array) -> jax.Array:
        # TODO(synk): iter_num/auto_step is Python-side state; inside a jitted
        # training step, pass the (traced) coeff explicitly to gradient_reverse.
        coeff = jnp.float32(self._coeff())
        if self.auto_step:
            self.step()
        return gradient_reverse(x, coeff)

    def step(self):
        self.iter_num += 1


# ---------------------------------------------------------------------------
if __name__ == "__main__":
    key = jax.random.PRNGKey(0)
    # NCHW input consistent with the module: batch=2, channels=4, spatial=16x16
    x = jax.random.normal(key, (2, 4, 16, 16), dtype=jnp.float32)

    grl = WarmStartGradientReverseLayer(alpha=1.0, lo=0.0, hi=1.0,
                                        max_iters=1000, auto_step=True)

    # Forward pass: exact identity (no kernel needed).
    y = jax.block_until_ready(grl(x))
    assert y.shape == x.shape and y.dtype == x.dtype
    assert bool(jnp.allclose(y, x)), "forward must be identity"

    coeff = jnp.float32(grl._coeff())  # coefficient at the current iteration

    # Backward on the small input (fused-XLA fallback path).
    g_small = jax.block_until_ready(
        jax.grad(lambda v: jnp.sum(gradient_reverse(v, coeff)))(x))
    assert bool(jnp.allclose(g_small, -coeff * jnp.ones_like(x), atol=1e-6)), \
        "backward must be -coeff * grad_output (small path)"

    # Backward on a slightly larger input to exercise the Pallas kernel path
    # (2x4x128x128 f32 = 512 KiB -> tiled (rows, 2048) slab, 2-step parallel grid).
    x_big = jax.random.normal(jax.random.PRNGKey(0), (2, 4, 128, 128),
                              dtype=jnp.float32)
    g_big = jax.block_until_ready(
        jax.grad(lambda v: jnp.sum(gradient_reverse(v, coeff)))(x_big))
    assert bool(jnp.allclose(g_big, -coeff * jnp.ones_like(x_big), atol=1e-6)), \
        "backward must be -coeff * grad_output (Pallas kernel path)"

    print("KERNEL_OK")
</pallas_src>

<mosaic_0001>
module attributes {stable_mosaic.version = 11 : i64} {
  func.func @_scale_kernel(%arg0: i32, %arg1: memref<32x2048xf32, #tpu.memory_space<vmem>>, %arg2: memref<1xf32, #tpu.memory_space<smem>>, %arg3: memref<32x2048xf32, #tpu.memory_space<vmem>>) attributes {dimension_semantics = [#tpu.dimension_semantics<parallel>], iteration_bounds = array<i64: 2>, scalar_prefetch = 0 : i64, scratch_operands = 0 : i64, tpu.core_type = #tpu.core_type<tc>, window_params = [{transform_indices = @transform_0, window_bounds = array<i64: 32, 2048>}, {transform_indices = @transform_1, window_bounds = array<i64: 1>}, {transform_indices = @transform_2, window_bounds = array<i64: 32, 2048>}]} {
    %c0 = arith.constant 0 : index
    %c0_0 = arith.constant 0 : index
    %0 = vector.load %arg1[%c0, %c0_0] : memref<32x2048xf32, #tpu.memory_space<vmem>>, vector<32x2048xf32>
    %c0_1 = arith.constant 0 : index
    %1 = memref.load %arg2[%c0_1] : memref<1xf32, #tpu.memory_space<smem>>
    %2 = vector.broadcast %1 : f32 to vector<32x2048xf32>
    %3 = arith.mulf %0, %2 : vector<32x2048xf32>
    %c0_2 = arith.constant 0 : index
    %c0_3 = arith.constant 0 : index
    %4 = vector.load %arg3[%c0_2, %c0_3] : memref<32x2048xf32, #tpu.memory_space<vmem>>, vector<32x2048xf32>
    tpu.vector_store %arg3[%c0_2, %c0_3], %3 {strides = array<i32>} : memref<32x2048xf32, #tpu.memory_space<vmem>>, vector<32x2048xf32>,
    return
  }
  func.func @transform_0(%arg0: i32) -> (i32, i32) {
    %c0_i32 = arith.constant 0 : i32
    %c0_i32_0 = arith.constant 0 : i32
    return %arg0, %c0_i32 : i32, i32
  }
  func.func @transform_1(%arg0: i32) -> i32 {
    %c0_i32 = arith.constant 0 : i32
    %c0_i32_0 = arith.constant 0 : i32
    return %c0_i32 : i32
  }
  func.func @transform_2(%arg0: i32) -> (i32, i32) {
    %c0_i32 = arith.constant 0 : i32
    %c0_i32_0 = arith.constant 0 : i32
    return %arg0, %c0_i32 : i32, i32
  }
}

</mosaic_0001>

<bundles_post_ra>
// kernel: tpu_custom_call.1
= control target key start
LH: loop header
LB: loop body
LE: loop exit
PB: predicated region body
PF: predicated region fallthrough
CT: control target
= control target key end

     0   :  { %s1001_s0 = inlined_call_operand.hbm [shape: f32[64,2048], index: 0, kind: input, shape index: {}, may-alias: {0,2}]   ;;  %s1002_s1 = inlined_call_operand.<no memory space> [shape: f32[1], index: 1, kind: input, shape index: {}]   ;;  %s1003_s2 = inlined_call_operand.hbm [shape: f32[64,2048], index: 2, kind: output, shape index: {}, may-alias: {0,2}]  }
   0x1   :  { %7 = sst [smem:[#allocation2]] %s1002_s1 }
   0x2   :  { %8 = vsyncpa [#allocation4], 0 }
   0x3   :  { %10 = vsyncpa [#allocation4 + $0x1], 0 }
   0x4   :  { %11 = vsyncpa [#allocation5], 0 }
   0x5   :  { %13 = vsyncpa [#allocation5 + $0x1], 0  ;;  %s640_s11 = smov 0   ;;  %s642_s12 = smov 0  }
   0x6   :  { %s644_s13 = smov 0   ;;  %s646_s14 = smov 0  }
   0x7 LB: > { %s661_s1 = sadd.s32 4294967295, %s614_s14   ;;  %s448_s15 = sadd.s32 4294967294, %s614_s14   ;;  %s614_s14 = sphi %s646_s14, %s1016_s14   ;;  %s610_s13 = sphi %s644_s13, %s1015_s13   ;;  %s606_s12 = sphi %s642_s12, %s1014_s12   ;;  %s602_s11 = sphi %s640_s11, %s1013_s11  }
   0x8   : > { %s665_s16 = sadd.s32 1, %s614_s14   ;;  %s26_s17 = sadd.s32 1, %s610_s13 }
   0x9   : > { %s23_s18 = ssub.s32 %s614_s14, %s665_s16  ;;  %p33_p0 = scmp.ne.s32.totalorder %s610_s13, %s606_s12 }
   0xa   : > { %p24_p1 = scmp.eq.s32.totalorder %s23_s18, 0  ;;  %p34_p2 = scmp.eq.s32.totalorder %s614_s14, 0 }
   0xb   : > { %p39_p3 = scmp.ne.s32.totalorder %s606_s12, %s602_s11  ;;  %p40_p4 = scmp.eq.s32.totalorder %s661_s1, 0 }
   0xc   : > { %s677_s19 = scalar_select %p24_p1, %s610_s13, %s26_s17  }
   0xd   : > { %p679_p5 = por %p34_p2, %p33_p0  ;;  %p683_p6 = por %p40_p4, %p39_p3 }
   0xe   : > { %p84_p7 = scmp.eq.s32.totalorder %s661_s1, 1  ;;  %p90_p8 = scmp.eq.s32.totalorder %s448_s15, 1 }
   0xf   : > { %p480_p10 = scmp.lt.s32.totalorder %s614_s14, 2  ;;  %s113_s24 = sand.u32 1, %s610_s13  }
  0x10   : > { %p690_p11 = por %p84_p7, %p33_p0  ;;  %p694_p12 = por %p90_p8, %p39_p3 }
  0x11   : > { %s465_s25 = sshll.u32 %s614_s14, 13  ;;  %s451_s26 = sshll.u32 %s113_s24, 9 }
  0x12   : > { %s1007_s22 = scalar_select %p690_p11, 1, 0 }
  0x13   : > { %s1008_s23 = scalar_select %p694_p12, 1, 0 }
  0x14   : > { %s703_s29 = scalar_lea.hbm %s1001_s0, %s465_s25  ;;  %s117_s30 = scalar_lea.vmem [#allocation3], %s451_s26 }
  0x15   : > { %s125_s3 = sshll.u32 %s117_s30, 4  ;;  %p707_p13 = pnand %p480_p10, %p679_p5  ;;  %s711_s3 = int_to_ptr.vmem [resolvable:$true] %s125_s3 }
  0x16   : > { %s713_s5 = scalar_lea.sflag [#allocation4], %s113_s24  ;;  %s518_s6 = scalar_lea.hbm %s703_s29, 8192 }
  0x17   : > { %p519_p0 = scmp.ne.s32.totalorder %s703_s29, %s518_s6  ;;  %p520_p1 = pneg %p707_p13 }
  0x18   : > { %s523_s9 = scalar_lea.hbm %s1001_s0, 16384  ;;  %p524_p4 = scmp.lt.u32.totalorder %s703_s29, %s1001_s0 }
  0x19   : > { %p521_p2 = pnand %p520_p1, %p519_p0  ;;  %p525_p5 = scmp.lt.u32.totalorder %s523_s9, %s518_s6 }
  0x1a   : > { %p527_p8 = scmp.lt.u32.totalorder %s518_s6, %s703_s29 }
  0x1b   : > { %p522_p3 = pneg %p521_p2  ;;  %p526_p7 = por %p525_p5, %p524_p4 }
  0x1d   : > { %p528_p10 = por %p527_p8, %p526_p7 }
  0x1f   : > { %p529_p9 = pnand %p528_p10, %p522_p3 }
  0x21   : > { %532 = shalt.err (!%p529_p9)
}
  0x22   : > { %s533_s17 = scalar_lea.vmem %s711_s3, 8192  ;;  %s616_s18 = smov [#allocation3]  }
  0x23   : > { %p534_p0 = scmp.ne.s32.totalorder %s711_s3, %s533_s17  ;;  %s538_s20 = sshll.u32 %s616_s18, 4  ;;  %s539_s20 = int_to_ptr.vmem [resolvable:$false] %s538_s20 }
  0x24   : > { %s540_s24 = scalar_lea.vmem %s539_s20, 16384  ;;  %p541_p11 = scmp.lt.s32.totalorder %s711_s3, %s539_s20 }
  0x25   : > { %p536_p2 = pnand %p534_p0, %p520_p1  ;;  %p542_p4 = scmp.lt.s32.totalorder %s540_s24, %s533_s17 }
  0x27   : > { %p537_p12 = pneg %p536_p2  ;;  %p543_p5 = por %p542_p4, %p541_p11 }
  0x29   : > { %p544_p7 = pnand %p543_p5, %p537_p12 }
  0x2b   : > { %547 = shalt.err (!%p544_p7)
}
  0x2c   : > { %s617_s25 = smov 2048   ;;  %s618_s26 = smov 128  }
  0x2d   : > { %475 = dma.hbm_to_vmem [thread:$0]  (!%p707_p13), %s703_s29, 8192, %s711_s3, %s713_s5, %s617_s25, %s617_s25, %s618_s26  }
  0x2e   : > { %p455_p9 = scmp.ge.s32.totalorder %s614_s14, 1  ;;  %p133_p1 = scmp.lt.s32.totalorder %s614_s14, 3 }
  0x30   : > { %p134_p3 = pnand %p455_p9, %p133_p1 }
  0x31   : > { %s744_s27 = sand.u32 (!%p134_p3), 1, %s606_s12  }
  0x32   : > { %137 = sbr.rel (%p134_p3) target bundleno = 113 (0x71), region = 28  ;;  %s456_s28 = sshll.u32 (!%p134_p3), %s744_s27, 9 }
  0x33   : > { %s140_s30 = scalar_lea.sflag (!%p134_p3), [#allocation4], %s744_s27  ;;  %s748_s6 = scalar_lea.vmem (!%p134_p3), [#allocation3], %s456_s28 }
  0x39   : > { %593 = dma.done.wait (%p683_p6), %s140_s30, 8192  }
  0x3a   : > { %595 = vsyncadd (%p683_p6), %s140_s30, 4294959104  ;;  %s230_s29 = sld [smem:[#allocation2]]  ;;  %v166_v0 = vld [vmem:[%s748_s6] sm:$0xff]  ;;  %v167_v2 = vld [vmem:[%s748_s6 + $0x8] sm:$0xff]  ;;  %s771_s21 = scalar_lea.vmem [#allocation6], %s456_s28 }
  0x3b   : > { %v168_v3 = vld [vmem:[%s748_s6 + $0x10] sm:$0xff]  ;;  %v169_v7 = vld [vmem:[%s748_s6 + $0x18] sm:$0xff]  ;;  %v170_v8 = vld [vmem:[%s748_s6 + $0x20] sm:$0xff]  ;;  %s467_s3 = sshll.u32 %s661_s1, 13  ;;  %s375_s4 = sshll.u32 %s771_s21, 4  ;;  %s949_s4 = int_to_ptr.vmem [resolvable:$true] %s375_s4 }
  0x3c   : > { %v171_v9 = vld [vmem:[%s748_s6 + $0x28] sm:$0xff]  ;;  %v172_v13 = vld [vmem:[%s748_s6 + $0x30] sm:$0xff]  ;;  %v173_v14 = vld [vmem:[%s748_s6 + $0x38] sm:$0xff]  ;;  %s947_s7 = scalar_lea.hbm %s1003_s2, %s467_s3  ;;  %s361_s8 = scalar_lea.sflag [#allocation5], %s744_s27 }
  0x3d   : > { %v174_v15 = vld [vmem:[%s748_s6 + $0x40] sm:$0xff]  ;;  %v175_v19 = vld [vmem:[%s748_s6 + $0x48] sm:$0xff]  ;;  %v176_v20 = vld [vmem:[%s748_s6 + $0x50] sm:$0xff]  ;;  %s548_s9 = scalar_lea.vmem %s949_s4, 8192  ;;  %p1010_p11 = scmp.ne.s32.totalorder %s1007_s22, 0 }
  0x3e   : > { %v177_v21 = vld [vmem:[%s748_s6 + $0x58] sm:$0xff]  ;;  %v178_v25 = vld [vmem:[%s748_s6 + $0x60] sm:$0xff]  ;;  %v179_v26 = vld [vmem:[%s748_s6 + $0x68] sm:$0xff]  ;;  %p549_p6 = scmp.ne.s32.totalorder %s949_s4, %s548_s9  ;;  %s619_s10 = smov [#allocation6]  }
  0x3f   : > { %v180_v27 = vld [vmem:[%s748_s6 + $0x70] sm:$0xff]  ;;  %v181_v31 = vld [vmem:[%s748_s6 + $0x78] sm:$0xff]  ;;  %v182_v32 = vld [vmem:[%s748_s6 + $0x80] sm:$0xff]  ;;  %s552_s15 = sshll.u32 %s619_s10, 4  ;;  %s553_s15 = int_to_ptr.vmem [resolvable:$false] %s552_s15 }
  0x40   : > { %v755_v1 = vstv %s230_s29  ;;  %v183_v33 = vld [vmem:[%s748_s6 + $0x88] sm:$0xff]  ;;  %v184_v37 = vld [vmem:[%s748_s6 + $0x90] sm:$0xff]  ;;  %v185_v38 = vld [vmem:[%s748_s6 + $0x98] sm:$0xff]  ;;  %p550_p12 = pnand %p549_p6, %p1010_p11  ;;  %s554_s17 = scalar_lea.vmem %s553_s15, 16384 }
  0x41   : > { %v232_v4 = vmul.f32 %v755_v1, %v166_v0  ;;  %v233_v5 = vmul.f32 %v755_v1, %v167_v2  ;;  %v234_v6 = vmul.f32 %v755_v1, %v168_v3  ;;  %v235_v10 = vmul.f32 %v755_v1, %v169_v7  ;;  %v186_v39 = vld [vmem:[%s748_s6 + $0xa0] sm:$0xff]  ;;  %v187_v43 = vld [vmem:[%s748_s6 + $0xa8] sm:$0xff]  ;;  %v188_v44 = vld [vmem:[%s748_s6 + $0xb0] sm:$0xff]  ;;  %p555_p8 = scmp.lt.s32.totalorder %s949_s4, %s553_s15  ;;  %p556_p10 = scmp.lt.s32.totalorder %s554_s17, %s548_s9 }
  0x42   : > { %v236_v11 = vmul.f32 %v755_v1, %v170_v8  ;;  %v237_v12 = vmul.f32 %v755_v1, %v171_v9  ;;  %v238_v16 = vmul.f32 %v755_v1, %v172_v13  ;;  %v239_v17 = vmul.f32 %v755_v1, %v173_v14  ;;  %v189_v45 = vld [vmem:[%s748_s6 + $0xb8] sm:$0xff]  ;;  %v190_v49 = vld [vmem:[%s748_s6 + $0xc0] sm:$0xff]  ;;  %v191_v50 = vld [vmem:[%s748_s6 + $0xc8] sm:$0xff]  ;;  %p551_p13 = pneg %p550_p12 }
  0x43   : > { %296 = vst [vmem:[%s771_s21] sm:$0xff] %v232_v4  ;;  %297 = vst [vmem:[%s771_s21 + $0x8] sm:$0xff] %v233_v5  ;;  %v240_v18 = vmul.f32 %v755_v1, %v174_v15  ;;  %v241_v22 = vmul.f32 %v755_v1, %v175_v19  ;;  %v242_v23 = vmul.f32 %v755_v1, %v176_v20  ;;  %v192_v51 = vld [vmem:[%s748_s6 + $0xd0] sm:$0xff]  ;;  %v193_v55 = vld [vmem:[%s748_s6 + $0xd8] sm:$0xff]  ;;  %p557_p0 = por %p556_p10, %p555_p8 }
  0x44   : > { %298 = vst [vmem:[%s771_s21 + $0x10] sm:$0xff] %v234_v6  ;;  %299 = vst [vmem:[%s771_s21 + $0x18] sm:$0xff] %v235_v10  ;;  %v243_v24 = vmul.f32 %v755_v1, %v177_v21  ;;  %v244_v28 = vmul.f32 %v755_v1, %v178_v25  ;;  %v245_v29 = vmul.f32 %v755_v1, %v179_v26  ;;  %v194_v56 = vld [vmem:[%s748_s6 + $0xe0] sm:$0xff]  ;;  %v195_v57 = vld [vmem:[%s748_s6 + $0xe8] sm:$0xff] }
  0x45   : > { %300 = vst [vmem:[%s771_s21 + $0x20] sm:$0xff] %v236_v11  ;;  %301 = vst [vmem:[%s771_s21 + $0x28] sm:$0xff] %v237_v12  ;;  %v246_v30 = vmul.f32 %v755_v1, %v180_v27  ;;  %v247_v34 = vmul.f32 %v755_v1, %v181_v31  ;;  %v248_v35 = vmul.f32 %v755_v1, %v182_v32  ;;  %v196_v61 = vld [vmem:[%s748_s6 + $0xf0] sm:$0xff]  ;;  %v197_v62 = vld [vmem:[%s748_s6 + $0xf8] sm:$0xff]  ;;  %p558_p2 = pnand %p557_p0, %p551_p13 }
  0x46   : > { %302 = vst [vmem:[%s771_s21 + $0x30] sm:$0xff] %v238_v16  ;;  %303 = vst [vmem:[%s771_s21 + $0x38] sm:$0xff] %v239_v17  ;;  %v249_v36 = vmul.f32 %v755_v1, %v183_v33  ;;  %v250_v40 = vmul.f32 %v755_v1, %v184_v37  ;;  %v251_v41 = vmul.f32 %v755_v1, %v185_v38  ;;  %v198_v63 = vld [vmem:[%s748_s6 + $0x100] sm:$0xff]  ;;  %v199_v4 = vld [vmem:[%s748_s6 + $0x108] sm:$0xff] }
  0x47   : > { %304 = vst [vmem:[%s771_s21 + $0x40] sm:$0xff] %v240_v18  ;;  %305 = vst [vmem:[%s771_s21 + $0x48] sm:$0xff] %v241_v22  ;;  %v252_v42 = vmul.f32 %v755_v1, %v186_v39  ;;  %v253_v46 = vmul.f32 %v755_v1, %v187_v43  ;;  %v254_v47 = vmul.f32 %v755_v1, %v188_v44  ;;  %v200_v5 = vld [vmem:[%s748_s6 + $0x110] sm:$0xff]  ;;  %v201_v6 = vld [vmem:[%s748_s6 + $0x118] sm:$0xff] }
  0x48   : > { %306 = vst [vmem:[%s771_s21 + $0x50] sm:$0xff] %v242_v23  ;;  %307 = vst [vmem:[%s771_s21 + $0x58] sm:$0xff] %v243_v24  ;;  %v255_v48 = vmul.f32 %v755_v1, %v189_v45  ;;  %v256_v52 = vmul.f32 %v755_v1, %v190_v49  ;;  %v257_v53 = vmul.f32 %v755_v1, %v191_v50  ;;  %v202_v10 = vld [vmem:[%s748_s6 + $0x120] sm:$0xff]  ;;  %v203_v11 = vld [vmem:[%s748_s6 + $0x128] sm:$0xff] }
  0x49   : > { %308 = vst [vmem:[%s771_s21 + $0x60] sm:$0xff] %v244_v28  ;;  %309 = vst [vmem:[%s771_s21 + $0x68] sm:$0xff] %v245_v29  ;;  %v258_v54 = vmul.f32 %v755_v1, %v192_v51  ;;  %v259_v58 = vmul.f32 %v755_v1, %v193_v55  ;;  %v260_v59 = vmul.f32 %v755_v1, %v194_v56  ;;  %v204_v12 = vld [vmem:[%s748_s6 + $0x130] sm:$0xff]  ;;  %v205_v16 = vld [vmem:[%s748_s6 + $0x138] sm:$0xff] }
  0x4a   : > { %310 = vst [vmem:[%s771_s21 + $0x70] sm:$0xff] %v246_v30  ;;  %311 = vst [vmem:[%s771_s21 + $0x78] sm:$0xff] %v247_v34  ;;  %v261_v60 = vmul.f32 %v755_v1, %v195_v57  ;;  %v262_v0 = vmul.f32 %v755_v1, %v196_v61  ;;  %v263_v2 = vmul.f32 %v755_v1, %v197_v62  ;;  %v206_v17 = vld [vmem:[%s748_s6 + $0x140] sm:$0xff]  ;;  %v207_v18 = vld [vmem:[%s748_s6 + $0x148] sm:$0xff] }
  0x4b   : > { %312 = vst [vmem:[%s771_s21 + $0x80] sm:$0xff] %v248_v35  ;;  %313 = vst [vmem:[%s771_s21 + $0x88] sm:$0xff] %v249_v36  ;;  %v264_v3 = vmul.f32 %v755_v1, %v198_v63  ;;  %v265_v7 = vmul.f32 %v755_v1, %v199_v4  ;;  %v266_v8 = vmul.f32 %v755_v1, %v200_v5  ;;  %v208_v22 = vld [vmem:[%s748_s6 + $0x150] sm:$0xff]  ;;  %v209_v23 = vld [vmem:[%s748_s6 + $0x158] sm:$0xff] }
  0x4c   : > { %314 = vst [vmem:[%s771_s21 + $0x90] sm:$0xff] %v250_v40  ;;  %315 = vst [vmem:[%s771_s21 + $0x98] sm:$0xff] %v251_v41  ;;  %v267_v9 = vmul.f32 %v755_v1, %v201_v6  ;;  %v268_v13 = vmul.f32 %v755_v1, %v202_v10  ;;  %v269_v14 = vmul.f32 %v755_v1, %v203_v11  ;;  %v210_v24 = vld [vmem:[%s748_s6 + $0x160] sm:$0xff]  ;;  %v211_v28 = vld [vmem:[%s748_s6 + $0x168] sm:$0xff] }
  0x4d   : > { %316 = vst [vmem:[%s771_s21 + $0xa0] sm:$0xff] %v252_v42  ;;  %317 = vst [vmem:[%s771_s21 + $0xa8] sm:$0xff] %v253_v46  ;;  %v270_v15 = vmul.f32 %v755_v1, %v204_v12  ;;  %v271_v19 = vmul.f32 %v755_v1, %v205_v16  ;;  %v272_v20 = vmul.f32 %v755_v1, %v206_v17  ;;  %v212_v29 = vld [vmem:[%s748_s6 + $0x170] sm:$0xff]  ;;  %v213_v30 = vld [vmem:[%s748_s6 + $0x178] sm:$0xff] }
  0x4e   : > { %318 = vst [vmem:[%s771_s21 + $0xb0] sm:$0xff] %v254_v47  ;;  %319 = vst [vmem:[%s771_s21 + $0xb8] sm:$0xff] %v255_v48  ;;  %v273_v21 = vmul.f32 %v755_v1, %v207_v18  ;;  %v274_v25 = vmul.f32 %v755_v1, %v208_v22  ;;  %v275_v26 = vmul.f32 %v755_v1, %v209_v23  ;;  %v214_v34 = vld [vmem:[%s748_s6 + $0x180] sm:$0xff]  ;;  %v215_v35 = vld [vmem:[%s748_s6 + $0x188] sm:$0xff] }
  0x4f   : > { %320 = vst [vmem:[%s771_s21 + $0xc0] sm:$0xff] %v256_v52  ;;  %321 = vst [vmem:[%s771_s21 + $0xc8] sm:$0xff] %v257_v53  ;;  %v276_v27 = vmul.f32 %v755_v1, %v210_v24  ;;  %v277_v31 = vmul.f32 %v755_v1, %v211_v28  ;;  %v278_v32 = vmul.f32 %v755_v1, %v212_v29  ;;  %v216_v36 = vld [vmem:[%s748_s6 + $0x190] sm:$0xff]  ;;  %v217_v40 = vld [vmem:[%s748_s6 + $0x198] sm:$0xff] }
  0x50   : > { %322 = vst [vmem:[%s771_s21 + $0xd0] sm:$0xff] %v258_v54  ;;  %323 = vst [vmem:[%s771_s21 + $0xd8] sm:$0xff] %v259_v58  ;;  %v279_v33 = vmul.f32 %v755_v1, %v213_v30  ;;  %v280_v37 = vmul.f32 %v755_v1, %v214_v34  ;;  %v281_v38 = vmul.f32 %v755_v1, %v215_v35  ;;  %v218_v41 = vld [vmem:[%s748_s6 + $0x1a0] sm:$0xff]  ;;  %v219_v42 = vld [vmem:[%s748_s6 + $0x1a8] sm:$0xff] }
  0x51   : > { %324 = vst [vmem:[%s771_s21 + $0xe0] sm:$0xff] %v260_v59  ;;  %325 = vst [vmem:[%s771_s21 + $0xe8] sm:$0xff] %v261_v60  ;;  %v282_v39 = vmul.f32 %v755_v1, %v216_v36  ;;  %v283_v43 = vmul.f32 %v755_v1, %v217_v40  ;;  %v284_v44 = vmul.f32 %v755_v1, %v218_v41  ;;  %v220_v46 = vld [vmem:[%s748_s6 + $0x1b0] sm:$0xff]  ;;  %v221_v47 = vld [vmem:[%s748_s6 + $0x1b8] sm:$0xff] }
  0x52   : > { %326 = vst [vmem:[%s771_s21 + $0xf0] sm:$0xff] %v262_v0  ;;  %327 = vst [vmem:[%s771_s21 + $0xf8] sm:$0xff] %v263_v2  ;;  %v285_v45 = vmul.f32 %v755_v1, %v219_v42  ;;  %v222_v48 = vld [vmem:[%s748_s6 + $0x1c0] sm:$0xff]  ;;  %v286_v49 = vmul.f32 %v755_v1, %v220_v46  ;;  %v287_v50 = vmul.f32 %v755_v1, %v221_v47  ;;  %v223_v52 = vld [vmem:[%s748_s6 + $0x1c8] sm:$0xff] }
  0x53   : > { %328 = vst [vmem:[%s771_s21 + $0x100] sm:$0xff] %v264_v3  ;;  %329 = vst [vmem:[%s771_s21 + $0x108] sm:$0xff] %v265_v7  ;;  %v288_v51 = vmul.f32 %v755_v1, %v222_v48  ;;  %v224_v53 = vld [vmem:[%s748_s6 + $0x1d0] sm:$0xff]  ;;  %v225_v54 = vld [vmem:[%s748_s6 + $0x1d8] sm:$0xff]  ;;  %v289_v55 = vmul.f32 %v755_v1, %v223_v52 }
  0x54   : > { %330 = vst [vmem:[%s771_s21 + $0x110] sm:$0xff] %v266_v8  ;;  %331 = vst [vmem:[%s771_s21 + $0x118] sm:$0xff] %v267_v9  ;;  %v290_v56 = vmul.f32 %v755_v1, %v224_v53  ;;  %v291_v57 = vmul.f32 %v755_v1, %v225_v54  ;;  %v226_v58 = vld [vmem:[%s748_s6 + $0x1e0] sm:$0xff]  ;;  %v227_v59 = vld [vmem:[%s748_s6 + $0x1e8] sm:$0xff] }
  0x55   : > { %332 = vst [vmem:[%s771_s21 + $0x120] sm:$0xff] %v268_v13  ;;  %333 = vst [vmem:[%s771_s21 + $0x128] sm:$0xff] %v269_v14  ;;  %v228_v60 = vld [vmem:[%s748_s6 + $0x1f0] sm:$0xff]  ;;  %v292_v61 = vmul.f32 %v755_v1, %v226_v58  ;;  %v293_v62 = vmul.f32 %v755_v1, %v227_v59  ;;  %v229_v0 = vld [vmem:[%s748_s6 + $0x1f8] sm:$0xff] }
  0x56   : > { %334 = vst [vmem:[%s771_s21 + $0x130] sm:$0xff] %v270_v15  ;;  %335 = vst [vmem:[%s771_s21 + $0x138] sm:$0xff] %v271_v19  ;;  %v294_v63 = vmul.f32 %v755_v1, %v228_v60  ;;  %v295_v2 = vmul.f32 %v755_v1, %v229_v0 }
  0x57   : > { %336 = vst [vmem:[%s771_s21 + $0x140] sm:$0xff] %v272_v20  ;;  %337 = vst [vmem:[%s771_s21 + $0x148] sm:$0xff] %v273_v21 }
  0x58   : > { %338 = vst [vmem:[%s771_s21 + $0x150] sm:$0xff] %v274_v25  ;;  %339 = vst [vmem:[%s771_s21 + $0x158] sm:$0xff] %v275_v26 }
  0x59   : > { %340 = vst [vmem:[%s771_s21 + $0x160] sm:$0xff] %v276_v27  ;;  %341 = vst [vmem:[%s771_s21 + $0x168] sm:$0xff] %v277_v31 }
  0x5a   : > { %342 = vst [vmem:[%s771_s21 + $0x170] sm:$0xff] %v278_v32  ;;  %343 = vst [vmem:[%s771_s21 + $0x178] sm:$0xff] %v279_v33 }
  0x5b   : > { %344 = vst [vmem:[%s771_s21 + $0x180] sm:$0xff] %v280_v37  ;;  %345 = vst [vmem:[%s771_s21 + $0x188] sm:$0xff] %v281_v38 }
  0x5c   : > { %346 = vst [vmem:[%s771_s21 + $0x190] sm:$0xff] %v282_v39  ;;  %347 = vst [vmem:[%s771_s21 + $0x198] sm:$0xff] %v283_v43 }
  0x5d   : > { %348 = vst [vmem:[%s771_s21 + $0x1a0] sm:$0xff] %v284_v44  ;;  %349 = vst [vmem:[%s771_s21 + $0x1a8] sm:$0xff] %v285_v45 }
  0x5e   : > { %350 = vst [vmem:[%s771_s21 + $0x1b0] sm:$0xff] %v286_v49  ;;  %351 = vst [vmem:[%s771_s21 + $0x1b8] sm:$0xff] %v287_v50 }
  0x5f   : > { %352 = vst [vmem:[%s771_s21 + $0x1c0] sm:$0xff] %v288_v51  ;;  %353 = vst [vmem:[%s771_s21 + $0x1c8] sm:$0xff] %v289_v55 }
  0x60   : > { %354 = vst [vmem:[%s771_s21 + $0x1d0] sm:$0xff] %v290_v56  ;;  %355 = vst [vmem:[%s771_s21 + $0x1d8] sm:$0xff] %v291_v57 }
  0x61   : > { %356 = vst [vmem:[%s771_s21 + $0x1e0] sm:$0xff] %v292_v61  ;;  %357 = vst [vmem:[%s771_s21 + $0x1e8] sm:$0xff] %v293_v62 }
  0x62   : > { %358 = vst [vmem:[%s771_s21 + $0x1f0] sm:$0xff] %v294_v63  ;;  %359 = vst [vmem:[%s771_s21 + $0x1f8] sm:$0xff] %v295_v2 }
  0x63   : > { %561 = shalt.err (!%p558_p2)
}
  0x64   : > { %s562_s18 = scalar_lea.hbm %s947_s7, 8192  ;;  %s566_s25 = scalar_lea.hbm %s1003_s2, 16384 }
  0x65   : > { %p563_p4 = scmp.ne.s32.totalorder %s947_s7, %s562_s18  ;;  %p567_p9 = scmp.lt.u32.totalorder %s947_s7, %s1003_s2 }
  0x66   : > { %p568_p1 = scmp.lt.u32.totalorder %s566_s25, %s562_s18  ;;  %p570_p6 = scmp.lt.u32.totalorder %s562_s18, %s947_s7 }
  0x67   : > { %p564_p5 = pnand %p563_p4, %p1010_p11 }
  0x68   : > { %p569_p3 = por %p568_p1, %p567_p9 }
  0x69   : > { %p565_p7 = pneg %p564_p5 }
  0x6a   : > { %p571_p12 = por %p570_p6, %p569_p3 }
  0x6c   : > { %p572_p13 = pnand %p571_p12, %p565_p7 }
  0x6e   : > { %575 = shalt.err (!%p572_p13)
}
  0x6f   : > { %s620_s30 = smov 2048   ;;  %s621_s6 = smov 128  }
  0x70   : > { %470 = dma.vmem_to_hbm [thread:$0]  (%p1010_p11), %s949_s4, 8192, %s947_s7, %s361_s8, %s620_s30, %s620_s30, %s621_s6  }
  0x71 PF: > { %s390_s29 = sand.u32 1, %s602_s11   ;;  %p1011_p8 = scmp.ne.s32.totalorder %s1008_s23, 0 }
  0x72   : > { %p1012_p10 = scmp.ge.s32.totalorder %s614_s14, 2  ;;  %s391_s21 = scalar_lea.sflag [#allocation5], %s390_s29 }
  0x74   : > { %p477_p0 = pnand %p1012_p10, %p1011_p8 }
  0x76   : > { %597 = dma.done.wait (!%p477_p0), %s391_s21, 8192  }
  0x77   : > { %599 = vsyncadd (!%p477_p0), %s391_s21, 4294959104  ;;  %p16_p2 = scmp.ge.s32.totalorder %s665_s16, 4   ;;  %s1013_s11 = smov %s606_s12 }
  0x78   : > { %s1014_s12 = smov %s610_s13  ;;  %s1015_s13 = smov %s677_s19 }
  0x79   : > { %s1016_s14 = smov %s665_s16  ;;  %18 = sbr.rel (!%p16_p2) target bundleno = 7 (0x7), region = 73 }
  0x80   :  { %396 = vsyncpa [#allocation4], 1 }
  0x81   :  { %398 = vsyncpa [#allocation4 + $0x1], 1 }
  0x82   :  { %399 = vsyncpa [#allocation5], 1 }
  0x83   :  { %401 = vsyncpa [#allocation5 + $0x1], 1 }

</bundles_post_ra>
